<compile_context>
chip_gen: v6e
topology: v6e:2x2x1
jax: 0.10.0
libtpu: 0.0.40
codegen_flags: <defaults>
</compile_context>

<pallas_src>
import jax
import jax.numpy as jnp
from jax.experimental import pallas as pl
from jax.experimental.pallas import tpu as pltpu


_SMALL_ELEMS = 64 * 1024          # ~256 KiB f32: below this, skip Pallas.
_MAX_TILE_BYTES = 2 * 1024 * 1024  # per-buffer tile budget (double-buffered).


def _round_up(a, b):
    return ((a + b - 1) // b) * b


def _sublane(dtype):
    # Packed sublane multiple: 8 for 4-byte, 16 for 2-byte, 32 for 1-byte dtypes.
    return max(8, 32 // jnp.dtype(dtype).itemsize)


def _h_wish_kernel(x_ref, o_ref):
    # Compute in f32 (free on the VPU for this HBM-bound op), store in out dtype.
    x = x_ref[...].astype(jnp.float32)
    gate = jnp.minimum(jnp.maximum(x + 3.0, 0.0), 6.0)
    o_ref[...] = (x * gate * (1.0 / 6.0)).astype(o_ref.dtype)


def h_wish(x):
    """Hard-swish: x * relu6(x + 3) / 6, fused in one Pallas kernel."""
    orig_shape = x.shape
    dtype = x.dtype
    total = int(x.size)
    if total == 0:
        return x

    if total < _SMALL_ELEMS:
        # Tiny activations: let XLA fuse this into the surrounding graph.
        return (x * jnp.clip(x + 3.0, 0.0, 6.0) * (1.0 / 6.0)).astype(dtype)

    flat = x.reshape(-1)
    itemsize = jnp.dtype(dtype).itemsize
    sub = _sublane(dtype)

    # Lane-dense layout: widest multiple of 128 that divides total -> no padding.
    lanes = None
    for cand in (2048, 1024, 512, 256, 128):
        if total % cand == 0:
            lanes = cand
            break

    if lanes is not None:
        rows = total // lanes
        x2d = flat.reshape(rows, lanes)          # metadata-only reshape
        padded = False
    else:
        # Rare fallback: total not a multiple of 128 -> pad to (rows, 128).
        lanes = 128
        rows = pl.cdiv(total, lanes)
        pad_elems = rows * lanes - total
        x2d = jnp.pad(flat, (0, pad_elems)).reshape(rows, lanes)
        padded = True

    # Row tile: <= ~2 MiB/buffer, multiple of the packed sublane, and at least
    # 2 grid steps so v7x's two TensorCores both pull from HBM.
    max_tm = max(sub, (_MAX_TILE_BYTES // (lanes * itemsize)) // sub * sub)
    tm = min(max_tm, _round_up(pl.cdiv(rows, 2), sub))
    tm = max(tm, sub)
    grid = (pl.cdiv(rows, tm),)                   # ragged last block is fine

    out = pl.pallas_call(
        _h_wish_kernel,
        out_shape=jax.ShapeDtypeStruct((rows, lanes), dtype),
        grid=grid,
        in_specs=[pl.BlockSpec((tm, lanes), lambda i: (i, 0))],
        out_specs=pl.BlockSpec((tm, lanes), lambda i: (i, 0)),
        compiler_params=pltpu.CompilerParams(
            dimension_semantics=("parallel",),
        ),
        cost_estimate=pl.CostEstimate(
            flops=3 * total,
            transcendentals=0,
            bytes_accessed=2 * total * itemsize,
        ),
    )(x2d)

    if padded:
        return out.reshape(-1)[:total].reshape(orig_shape)
    return out.reshape(orig_shape)


def _h_wish_ref(x):
    # Pure-JAX reference matching the PyTorch module: x * relu6(x + 3) / 6.
    xf = x.astype(jnp.float32)
    return xf * jnp.clip(xf + 3.0, 0.0, 6.0) / 6.0


if __name__ == "__main__":
    key = jax.random.PRNGKey(0)
    k1, k2, k3, k4 = jax.random.split(key, 4)

    # 1) Tiny NCHW activation (typical MPMTNet_T usage) -> fused-XLA fast path.
    x_small = jax.random.normal(k1, (2, 4, 16, 16), dtype=jnp.float32) * 3.0
    y_small = h_wish(x_small)
    jax.block_until_ready(y_small)
    assert y_small.shape == x_small.shape
    assert jnp.allclose(y_small, _h_wish_ref(x_small), atol=1e-6, rtol=1e-6)

    # 2) f32 tensor large enough for the Pallas path (lanes=2048, 2 grid steps,
    #    no padding, no trailing slice).
    x_f32 = jax.random.normal(k2, (2, 64, 32, 32), dtype=jnp.float32) * 3.0
    y_f32 = h_wish(x_f32)
    jax.block_until_ready(y_f32)
    assert jnp.allclose(y_f32, _h_wish_ref(x_f32), atol=1e-6, rtol=1e-6)

    # 3) bf16 path: 16-sublane tile, f32 compute in-kernel, bf16 store.
    x_bf16 = (jax.random.normal(k3, (2, 128, 32, 32), dtype=jnp.float32) * 3.0
              ).astype(jnp.bfloat16)
    y_bf16 = h_wish(x_bf16)
    jax.block_until_ready(y_bf16)
    assert jnp.allclose(y_bf16.astype(jnp.float32), _h_wish_ref(x_bf16),
                        atol=1e-2, rtol=1e-2)

    # 4) Awkward shape (size not a multiple of 128) -> padded fallback + ragged
    #    last block via the cdiv grid.
    x_odd = jax.random.normal(k4, (3, 7, 61, 61), dtype=jnp.float32) * 3.0
    y_odd = h_wish(x_odd)
    jax.block_until_ready(y_odd)
    assert y_odd.shape == x_odd.shape
    assert jnp.allclose(y_odd, _h_wish_ref(x_odd), atol=1e-6, rtol=1e-6)

    print("KERNEL_OK")
</pallas_src>

<mosaic_0001>
module attributes {stable_mosaic.version = 11 : i64} {
  func.func @_h_wish_kernel(%arg0: i32, %arg1: memref<32x2048xf32, #tpu.memory_space<vmem>>, %arg2: memref<32x2048xf32, #tpu.memory_space<vmem>>) attributes {dimension_semantics = [#tpu.dimension_semantics<parallel>], iteration_bounds = array<i64: 2>, scalar_prefetch = 0 : i64, scratch_operands = 0 : i64, tpu.core_type = #tpu.core_type<tc>, window_params = [{transform_indices = @transform_0, window_bounds = array<i64: 32, 2048>}, {transform_indices = @transform_1, window_bounds = array<i64: 32, 2048>}]} {
    %c0 = arith.constant 0 : index
    %c0_0 = arith.constant 0 : index
    %0 = vector.load %arg1[%c0, %c0_0] : memref<32x2048xf32, #tpu.memory_space<vmem>>, vector<32x2048xf32>
    %cst = arith.constant 3.000000e+00 : f32
    %1 = vector.broadcast %cst : f32 to vector<32x2048xf32>
    %2 = arith.addf %0, %1 : vector<32x2048xf32>
    %cst_1 = arith.constant 0.000000e+00 : f32
    %3 = vector.broadcast %cst_1 : f32 to vector<32x2048xf32>
    %4 = arith.maximumf %2, %3 : vector<32x2048xf32>
    %cst_2 = arith.constant 6.000000e+00 : f32
    %5 = vector.broadcast %cst_2 : f32 to vector<32x2048xf32>
    %6 = arith.minimumf %4, %5 : vector<32x2048xf32>
    %7 = arith.mulf %0, %6 : vector<32x2048xf32>
    %cst_3 = arith.constant 0.166666672 : f32
    %8 = vector.broadcast %cst_3 : f32 to vector<32x2048xf32>
    %9 = arith.mulf %7, %8 : vector<32x2048xf32>
    %c0_4 = arith.constant 0 : index
    %c0_5 = arith.constant 0 : index
    %10 = vector.load %arg2[%c0_4, %c0_5] : memref<32x2048xf32, #tpu.memory_space<vmem>>, vector<32x2048xf32>
    tpu.vector_store %arg2[%c0_4, %c0_5], %9 {strides = array<i32>} : memref<32x2048xf32, #tpu.memory_space<vmem>>, vector<32x2048xf32>,
    return
  }
  func.func @transform_0(%arg0: i32) -> (i32, i32) {
    %c0_i32 = arith.constant 0 : i32
    %c0_i32_0 = arith.constant 0 : i32
    return %arg0, %c0_i32 : i32, i32
  }
  func.func @transform_1(%arg0: i32) -> (i32, i32) {
    %c0_i32 = arith.constant 0 : i32
    %c0_i32_0 = arith.constant 0 : i32
    return %arg0, %c0_i32 : i32, i32
  }
}

</mosaic_0001>

<bundles_post_ra>
// kernel: tpu_custom_call.1
= control target key start
LH: loop header
LB: loop body
LE: loop exit
PB: predicated region body
PF: predicated region fallthrough
CT: control target
= control target key end

     0   :  { %6 = vsyncpa [#allocation3], 0  ;;  %s1145_s0 = inlined_call_operand.hbm [shape: f32[64,2048], index: 0, kind: input, shape index: {}]   ;;  %s1146_s1 = inlined_call_operand.hbm [shape: f32[64,2048], index: 1, kind: output, shape index: {}]  }
   0x1   :  { %8 = vsyncpa [#allocation3 + $0x1], 0 }
   0x2   :  { %9 = vsyncpa [#allocation4], 0 }
   0x3   :  { %11 = vsyncpa [#allocation4 + $0x1], 0  ;;  %s854_s6 = smov 0   ;;  %s856_s7 = smov 0  }
   0x4   :  { %s858_s8 = smov 0   ;;  %s860_s9 = smov 0  }
   0x5 LB: > { %s875_s10 = sadd.s32 4294967295, %s836_s9   ;;  %s674_s11 = sadd.s32 4294967294, %s836_s9   ;;  %s836_s9 = sphi %s860_s9, %s1161_s9   ;;  %s832_s8 = sphi %s858_s8, %s1160_s8   ;;  %s828_s7 = sphi %s856_s7, %s1159_s7   ;;  %s824_s6 = sphi %s854_s6, %s1158_s6  }
   0x6   : > { %s879_s12 = sadd.s32 1, %s836_s9   ;;  %s24_s13 = sadd.s32 1, %s832_s8 }
   0x7   : > { %s21_s14 = ssub.s32 %s836_s9, %s879_s12  ;;  %p31_p0 = scmp.ne.s32.totalorder %s832_s8, %s828_s7 }
   0x8   : > { %p22_p1 = scmp.eq.s32.totalorder %s21_s14, 0  ;;  %p32_p2 = scmp.eq.s32.totalorder %s836_s9, 0 }
   0x9   : > { %p37_p3 = scmp.ne.s32.totalorder %s828_s7, %s824_s6  ;;  %p38_p4 = scmp.eq.s32.totalorder %s875_s10, 0 }
   0xa   : > { %s891_s15 = scalar_select %p22_p1, %s832_s8, %s24_s13  }
   0xb   : > { %p893_p5 = por %p32_p2, %p31_p0  ;;  %p897_p6 = por %p38_p4, %p37_p3 }
   0xc   : > { %p61_p7 = scmp.eq.s32.totalorder %s875_s10, 1  ;;  %p67_p8 = scmp.eq.s32.totalorder %s674_s11, 1 }
   0xd   : > { %s1150_s17 = scalar_select %p897_p6, 1, 0 }
   0xe   : > { %p706_p10 = scmp.lt.s32.totalorder %s836_s9, 2  ;;  %p904_p11 = por %p61_p7, %p31_p0 }
   0xf   : > { %p908_p12 = por %p67_p8, %p37_p3  ;;  %s87_s20 = sand.u32 1, %s832_s8  }
  0x10   : > { %s1151_s18 = scalar_select %p904_p11, 1, 0 }
  0x11   : > { %s1152_s19 = scalar_select %p908_p12, 1, 0 }
  0x12   : > { %s691_s21 = sshll.u32 %s836_s9, 13  ;;  %s677_s22 = sshll.u32 %s87_s20, 9 }
  0x13   : > { %s917_s25 = scalar_lea.hbm %s1145_s0, %s691_s21  ;;  %s91_s26 = scalar_lea.vmem [#allocation2], %s677_s22 }
  0x14   : > { %s99_s27 = sshll.u32 %s91_s26, 4  ;;  %p921_p13 = pnand %p706_p10, %p893_p5  ;;  %s925_s27 = int_to_ptr.vmem [resolvable:$true] %s99_s27 }
  0x15   : > { %s927_s29 = scalar_lea.sflag [#allocation3], %s87_s20  ;;  %s744_s30 = scalar_lea.hbm %s917_s25, 8192 }
  0x16   : > { %p745_p0 = scmp.ne.s32.totalorder %s917_s25, %s744_s30  ;;  %p746_p1 = pneg %p921_p13 }
  0x17   : > { %s749_s4 = scalar_lea.hbm %s1145_s0, 16384  ;;  %p750_p4 = scmp.lt.s32.totalorder %s917_s25, %s1145_s0 }
  0x18   : > { %p747_p2 = pnand %p746_p1, %p745_p0  ;;  %p751_p5 = scmp.lt.s32.totalorder %s749_s4, %s744_s30 }
  0x1a   : > { %p748_p3 = pneg %p747_p2  ;;  %p752_p7 = por %p751_p5, %p750_p4 }
  0x1c   : > { %p753_p8 = pnand %p752_p7, %p748_p3 }
  0x1e   : > { %756 = shalt.err (!%p753_p8)
}
  0x1f   : > { %s757_s13 = scalar_lea.vmem %s925_s27, 8192  ;;  %s838_s14 = smov [#allocation2]  }
  0x20   : > { %p758_p10 = scmp.ne.s32.totalorder %s925_s27, %s757_s13  ;;  %s762_s16 = sshll.u32 %s838_s14, 4  ;;  %s763_s16 = int_to_ptr.vmem [resolvable:$false] %s762_s16 }
  0x21   : > { %s764_s20 = scalar_lea.vmem %s763_s16, 16384  ;;  %p765_p2 = scmp.lt.s32.totalorder %s925_s27, %s763_s16 }
  0x22   : > { %p760_p9 = pnand %p758_p10, %p746_p1  ;;  %p766_p12 = scmp.lt.s32.totalorder %s764_s20, %s757_s13 }
  0x24   : > { %p761_p0 = pneg %p760_p9  ;;  %p767_p11 = por %p766_p12, %p765_p2 }
  0x26   : > { %p768_p6 = pnand %p767_p11, %p761_p0 }
  0x28   : > { %771 = shalt.err (!%p768_p6)
}
  0x29   : > { %s839_s21 = smov 2048   ;;  %s840_s22 = smov 128  }
  0x2a   : > { %701 = dma.hbm_to_vmem [thread:$0]  (!%p921_p13), %s917_s25, 8192, %s925_s27, %s927_s29, %s839_s21, %s839_s21, %s840_s22  }
  0x2b   : > { %p681_p9 = scmp.ge.s32.totalorder %s836_s9, 1  ;;  %p107_p1 = scmp.lt.s32.totalorder %s836_s9, 3 }
  0x2d   : > { %p108_p3 = pnand %p681_p9, %p107_p1 }
  0x2e   : > { %s951_s23 = sand.u32 (!%p108_p3), 1, %s828_s7   ;;  %p1154_p6 = scmp.ne.s32.totalorder (!%p108_p3), %s1150_s17, 0 }
  0x2f   : > { %111 = sbr.rel (%p108_p3) target bundleno = 156 (0x9c), region = 24  ;;  %s682_s24 = sshll.u32 (!%p108_p3), %s951_s23, 9 }
  0x30   : > { %s114_s26 = scalar_lea.sflag (!%p108_p3), [#allocation3], %s951_s23  ;;  %s957_s30 = scalar_lea.vmem (!%p108_p3), [#allocation2], %s682_s24 }
  0x34   : > { %815 = dma.done.wait (%p1154_p6), %s114_s26, 8192  }
  0x35   : > { %817 = vsyncadd (%p1154_p6), %s114_s26, 4294959104  ;;  %v138_v0 = vld [vmem:[%s957_s30] sm:$0xff]  ;;  %v139_v1 = vld [vmem:[%s957_s30 + $0x8] sm:$0xff]  ;;  %s980_s17 = scalar_lea.vmem [#allocation5], %s682_s24  ;;  %s693_s25 = sshll.u32 %s875_s10, 13 }
  0x36   : > { %v140_v2 = vld [vmem:[%s957_s30 + $0x10] sm:$0xff]  ;;  %v202_v3 = vadd.f32 3.0, %v138_v0  ;;  %v203_v4 = vadd.f32 3.0, %v139_v1  ;;  %v141_v6 = vld [vmem:[%s957_s30 + $0x18] sm:$0xff]  ;;  %v142_v7 = vld [vmem:[%s957_s30 + $0x20] sm:$0xff]  ;;  %s601_s27 = sshll.u32 %s980_s17, 4  ;;  %s1095_s29 = scalar_lea.hbm %s1146_s1, %s693_s25  ;;  %s1097_s27 = int_to_ptr.vmem [resolvable:$true] %s601_s27 }
  0x37   : > { %v204_v5 = vadd.f32 3.0, %v140_v2  ;;  %v143_v8 = vld [vmem:[%s957_s30 + $0x28] sm:$0xff]  ;;  %v205_v9 = vadd.f32 3.0, %v141_v6  ;;  %v206_v10 = vadd.f32 3.0, %v142_v7  ;;  %v144_v12 = vld [vmem:[%s957_s30 + $0x30] sm:$0xff]  ;;  %v145_v13 = vld [vmem:[%s957_s30 + $0x38] sm:$0xff] }
  0x38   : > { %v207_v11 = vadd.f32 3.0, %v143_v8  ;;  %v266_v14 = vmax.f32 %v202_v3, 0.0  ;;  %v267_v15 = vmax.f32 %v203_v4, 0.0  ;;  %v208_v17 = vadd.f32 3.0, %v144_v12  ;;  %v146_v30 = vld [vmem:[%s957_s30 + $0x40] sm:$0xff]  ;;  %v147_v35 = vld [vmem:[%s957_s30 + $0x48] sm:$0xff] }
  0x39   : > { %v268_v16 = vmax.f32 %v204_v5, 0.0  ;;  %v269_v18 = vmax.f32 %v205_v9, 0.0  ;;  %v270_v19 = vmax.f32 %v206_v10, 0.0  ;;  %v209_v21 = vadd.f32 3.0, %v145_v13  ;;  %v148_v36 = vld [vmem:[%s957_s30 + $0x50] sm:$0xff]  ;;  %v149_v37 = vld [vmem:[%s957_s30 + $0x58] sm:$0xff] }
  0x3a   : > { %v271_v20 = vmax.f32 %v207_v11, 0.0  ;;  %v330_v22 = vmin.f32 %v266_v14, 6.0  ;;  %v331_v23 = vmin.f32 %v267_v15, 6.0  ;;  %v272_v25 = vmax.f32 %v208_v17, 0.0  ;;  %v150_v42 = vld [vmem:[%s957_s30 + $0x60] sm:$0xff]  ;;  %v151_v43 = vld [vmem:[%s957_s30 + $0x68] sm:$0xff] }
  0x3b   : > { %v332_v24 = vmin.f32 %v268_v16, 6.0  ;;  %v333_v26 = vmin.f32 %v269_v18, 6.0  ;;  %v334_v27 = vmin.f32 %v270_v19, 6.0  ;;  %v273_v29 = vmax.f32 %v209_v21, 0.0  ;;  %v152_v44 = vld [vmem:[%s957_s30 + $0x70] sm:$0xff]  ;;  %v153_v57 = vld [vmem:[%s957_s30 + $0x78] sm:$0xff] }
  0x3c   : > { %v335_v28 = vmin.f32 %v271_v20, 6.0  ;;  %v394_v31 = vmul.f32 %v330_v22, %v138_v0  ;;  %v395_v32 = vmul.f32 %v331_v23, %v139_v1  ;;  %v336_v34 = vmin.f32 %v272_v25, 6.0  ;;  %v154_v14 = vld [vmem:[%s957_s30 + $0x80] sm:$0xff]  ;;  %v155_v19 = vld [vmem:[%s957_s30 + $0x88] sm:$0xff]  ;;  %v156_v20 = vld [vmem:[%s957_s30 + $0x90] sm:$0xff]  ;;  %s587_s2 = scalar_lea.sflag [#allocation4], %s951_s23 }
  0x3d   : > { %v396_v33 = vmul.f32 %v332_v24, %v140_v2  ;;  %v397_v38 = vmul.f32 %v333_v26, %v141_v6  ;;  %v398_v39 = vmul.f32 %v334_v27, %v142_v7  ;;  %v337_v41 = vmin.f32 %v273_v29, 6.0  ;;  %v157_v21 = vld [vmem:[%s957_s30 + $0x98] sm:$0xff]  ;;  %v158_v26 = vld [vmem:[%s957_s30 + $0xa0] sm:$0xff]  ;;  %v159_v27 = vld [vmem:[%s957_s30 + $0xa8] sm:$0xff]  ;;  %s772_s3 = scalar_lea.vmem %s1097_s27, 8192  ;;  %p1155_p12 = scmp.ne.s32.totalorder %s1151_s18, 0 }
  0x3e   : > { %v399_v40 = vmul.f32 %v335_v28, %v143_v8  ;;  %v458_v45 = vmul.f32 0.16666667, %v394_v31  ;;  %v459_v46 = vmul.f32 0.16666667, %v395_v32  ;;  %v400_v48 = vmul.f32 %v336_v34, %v144_v12  ;;  %v160_v28 = vld [vmem:[%s957_s30 + $0xb0] sm:$0xff]  ;;  %p773_p11 = scmp.ne.s32.totalorder %s1097_s27, %s772_s3  ;;  %s841_s4 = smov [#allocation5]  }
  0x3f   : > { %v460_v47 = vmul.f32 0.16666667, %v396_v33  ;;  %v461_v49 = vmul.f32 0.16666667, %v397_v38  ;;  %v462_v50 = vmul.f32 0.16666667, %v398_v39  ;;  %v401_v52 = vmul.f32 %v337_v41, %v145_v13 }
  0x40   : > { %v463_v51 = vmul.f32 0.16666667, %v399_v40  ;;  %522 = vst [vmem:[%s980_s17] sm:$0xff] %v458_v45  ;;  %523 = vst [vmem:[%s980_s17 + $0x8] sm:$0xff] %v459_v46  ;;  %v464_v53 = vmul.f32 0.16666667, %v400_v48  ;;  %v210_v54 = vadd.f32 3.0, %v146_v30  ;;  %p774_p13 = pnand %p773_p11, %p1155_p12 }
  0x41   : > { %524 = vst [vmem:[%s980_s17 + $0x10] sm:$0xff] %v460_v47  ;;  %v211_v55 = vadd.f32 3.0, %v147_v35  ;;  %v212_v56 = vadd.f32 3.0, %v148_v36  ;;  %525 = vst [vmem:[%s980_s17 + $0x18] sm:$0xff] %v461_v49  ;;  %v465_v58 = vmul.f32 0.16666667, %v401_v52 }
  0x42   : > { %526 = vst [vmem:[%s980_s17 + $0x20] sm:$0xff] %v462_v50  ;;  %527 = vst [vmem:[%s980_s17 + $0x28] sm:$0xff] %v463_v51  ;;  %v213_v59 = vadd.f32 3.0, %v149_v37  ;;  %v214_v60 = vadd.f32 3.0, %v150_v42  ;;  %v215_v61 = vadd.f32 3.0, %v151_v43  ;;  %v274_v62 = vmax.f32 %v210_v54, 0.0  ;;  %p775_p4 = pneg %p774_p13 }
  0x43   : > { %528 = vst [vmem:[%s980_s17 + $0x30] sm:$0xff] %v464_v53  ;;  %v275_v63 = vmax.f32 %v211_v55, 0.0  ;;  %v276_v0 = vmax.f32 %v212_v56, 0.0  ;;  %v216_v1 = vadd.f32 3.0, %v152_v44  ;;  %529 = vst [vmem:[%s980_s17 + $0x38] sm:$0xff] %v465_v58  ;;  %v217_v5 = vadd.f32 3.0, %v153_v57 }
  0x44   : > { %v277_v2 = vmax.f32 %v213_v59, 0.0  ;;  %v278_v3 = vmax.f32 %v214_v60, 0.0  ;;  %v279_v4 = vmax.f32 %v215_v61, 0.0  ;;  %v338_v6 = vmin.f32 %v274_v62, 6.0  ;;  %v161_v41 = vld [vmem:[%s957_s30 + $0xb8] sm:$0xff]  ;;  %v162_v62 = vld [vmem:[%s957_s30 + $0xc0] sm:$0xff] }
  0x45   : > { %v339_v7 = vmin.f32 %v275_v63, 6.0  ;;  %v340_v8 = vmin.f32 %v276_v0, 6.0  ;;  %v280_v9 = vmax.f32 %v216_v1, 0.0  ;;  %v281_v13 = vmax.f32 %v217_v5, 0.0  ;;  %v165_v5 = vld [vmem:[%s957_s30 + $0xd8] sm:$0xff]  ;;  %s776_s5 = sshll.u32 %s841_s4, 4  ;;  %s777_s5 = int_to_ptr.vmem [resolvable:$false] %s776_s5 }
  0x46   : > { %v341_v10 = vmin.f32 %v277_v2, 6.0  ;;  %v342_v11 = vmin.f32 %v278_v3, 6.0  ;;  %v343_v12 = vmin.f32 %v279_v4, 6.0  ;;  %v402_v15 = vmul.f32 %v338_v6, %v146_v30  ;;  %v163_v3 = vld [vmem:[%s957_s30 + $0xc8] sm:$0xff]  ;;  %v164_v4 = vld [vmem:[%s957_s30 + $0xd0] sm:$0xff]  ;;  %s778_s11 = scalar_lea.vmem %s777_s5, 16384  ;;  %p779_p5 = scmp.lt.s32.totalorder %s1097_s27, %s777_s5 }
  0x47   : > { %v403_v16 = vmul.f32 %v339_v7, %v147_v35  ;;  %v404_v17 = vmul.f32 %v340_v8, %v148_v36  ;;  %v344_v18 = vmin.f32 %v280_v9, 6.0  ;;  %v345_v25 = vmin.f32 %v281_v13, 6.0  ;;  %p780_p7 = scmp.lt.s32.totalorder %s778_s11, %s772_s3 }
  0x48   : > { %v405_v22 = vmul.f32 %v341_v10, %v149_v37  ;;  %v406_v23 = vmul.f32 %v342_v11, %v150_v42  ;;  %v407_v24 = vmul.f32 %v343_v12, %v151_v43  ;;  %v466_v29 = vmul.f32 0.16666667, %v402_v15  ;;  %v166_v10 = vld [vmem:[%s957_s30 + $0xe0] sm:$0xff]  ;;  %v167_v11 = vld [vmem:[%s957_s30 + $0xe8] sm:$0xff]  ;;  %v168_v12 = vld [vmem:[%s957_s30 + $0xf0] sm:$0xff] }
  0x49   : > { %v467_v30 = vmul.f32 0.16666667, %v403_v16  ;;  %v468_v31 = vmul.f32 0.16666667, %v404_v17  ;;  %v408_v32 = vmul.f32 %v344_v18, %v152_v44  ;;  %v409_v36 = vmul.f32 %v345_v25, %v153_v57  ;;  %v169_v25 = vld [vmem:[%s957_s30 + $0xf8] sm:$0xff]  ;;  %p781_p8 = por %p780_p7, %p779_p5 }
  0x4a   : > { %v469_v33 = vmul.f32 0.16666667, %v405_v22  ;;  %v470_v34 = vmul.f32 0.16666667, %v406_v23  ;;  %v471_v35 = vmul.f32 0.16666667, %v407_v24 }
  0x4b   : > { %530 = vst [vmem:[%s980_s17 + $0x40] sm:$0xff] %v466_v29  ;;  %531 = vst [vmem:[%s980_s17 + $0x48] sm:$0xff] %v467_v30  ;;  %v472_v37 = vmul.f32 0.16666667, %v408_v32  ;;  %v218_v38 = vadd.f32 3.0, %v154_v14  ;;  %v219_v39 = vadd.f32 3.0, %v155_v19  ;;  %p782_p10 = pnand %p781_p8, %p775_p4 }
  0x4c   : > { %532 = vst [vmem:[%s980_s17 + $0x50] sm:$0xff] %v468_v31  ;;  %v220_v40 = vadd.f32 3.0, %v156_v20  ;;  %533 = vst [vmem:[%s980_s17 + $0x58] sm:$0xff] %v469_v33  ;;  %v473_v42 = vmul.f32 0.16666667, %v409_v36  ;;  %v221_v43 = vadd.f32 3.0, %v157_v21 }
  0x4d   : > { %534 = vst [vmem:[%s980_s17 + $0x60] sm:$0xff] %v470_v34  ;;  %535 = vst [vmem:[%s980_s17 + $0x68] sm:$0xff] %v471_v35  ;;  %v222_v44 = vadd.f32 3.0, %v158_v26  ;;  %v223_v45 = vadd.f32 3.0, %v159_v27  ;;  %v282_v46 = vmax.f32 %v218_v38, 0.0  ;;  %v283_v47 = vmax.f32 %v219_v39, 0.0 }
  0x4e   : > { %536 = vst [vmem:[%s980_s17 + $0x70] sm:$0xff] %v472_v37  ;;  %v284_v48 = vmax.f32 %v220_v40, 0.0  ;;  %v224_v49 = vadd.f32 3.0, %v160_v28  ;;  %537 = vst [vmem:[%s980_s17 + $0x78] sm:$0xff] %v473_v42  ;;  %v285_v50 = vmax.f32 %v221_v43, 0.0  ;;  %v225_v53 = vadd.f32 3.0, %v161_v41 }
  0x4f   : > { %v286_v51 = vmax.f32 %v222_v44, 0.0  ;;  %v287_v52 = vmax.f32 %v223_v45, 0.0  ;;  %v346_v54 = vmin.f32 %v282_v46, 6.0  ;;  %v347_v55 = vmin.f32 %v283_v47, 6.0  ;;  %v170_v46 = vld [vmem:[%s957_s30 + $0x100] sm:$0xff] }
  0x50   : > { %v348_v56 = vmin.f32 %v284_v48, 6.0  ;;  %v288_v57 = vmax.f32 %v224_v49, 0.0  ;;  %v349_v58 = vmin.f32 %v285_v50, 6.0  ;;  %v289_v61 = vmax.f32 %v225_v53, 0.0  ;;  %v173_v53 = vld [vmem:[%s957_s30 + $0x118] sm:$0xff] }
  0x51   : > { %v350_v59 = vmin.f32 %v286_v51, 6.0  ;;  %v351_v60 = vmin.f32 %v287_v52, 6.0  ;;  %v410_v63 = vmul.f32 %v346_v54, %v154_v14  ;;  %v411_v0 = vmul.f32 %v347_v55, %v155_v19  ;;  %v171_v51 = vld [vmem:[%s957_s30 + $0x108] sm:$0xff]  ;;  %v172_v52 = vld [vmem:[%s957_s30 + $0x110] sm:$0xff] }
  0x52   : > { %v412_v1 = vmul.f32 %v348_v56, %v156_v20  ;;  %v352_v2 = vmin.f32 %v288_v57, 6.0  ;;  %v413_v6 = vmul.f32 %v349_v58, %v157_v21  ;;  %v353_v9 = vmin.f32 %v289_v61, 6.0  ;;  %v174_v58 = vld [vmem:[%s957_s30 + $0x120] sm:$0xff] }
  0x53   : > { %v414_v7 = vmul.f32 %v350_v59, %v158_v26  ;;  %v415_v8 = vmul.f32 %v351_v60, %v159_v27  ;;  %v474_v13 = vmul.f32 0.16666667, %v410_v63  ;;  %v475_v14 = vmul.f32 0.16666667, %v411_v0  ;;  %v175_v59 = vld [vmem:[%s957_s30 + $0x128] sm:$0xff]  ;;  %v176_v60 = vld [vmem:[%s957_s30 + $0x130] sm:$0xff] }
  0x54   : > { %v476_v15 = vmul.f32 0.16666667, %v412_v1  ;;  %v416_v16 = vmul.f32 %v352_v2, %v160_v28  ;;  %v477_v17 = vmul.f32 0.16666667, %v413_v6  ;;  %v417_v20 = vmul.f32 %v353_v9, %v161_v41  ;;  %v177_v9 = vld [vmem:[%s957_s30 + $0x138] sm:$0xff] }
  0x55   : > { %v478_v18 = vmul.f32 0.16666667, %v414_v7  ;;  %v479_v19 = vmul.f32 0.16666667, %v415_v8  ;;  %538 = vst [vmem:[%s980_s17 + $0x80] sm:$0xff] %v474_v13  ;;  %539 = vst [vmem:[%s980_s17 + $0x88] sm:$0xff] %v475_v14 }
  0x56   : > { %540 = vst [vmem:[%s980_s17 + $0x90] sm:$0xff] %v476_v15  ;;  %v480_v21 = vmul.f32 0.16666667, %v416_v16  ;;  %v226_v22 = vadd.f32 3.0, %v162_v62  ;;  %v227_v23 = vadd.f32 3.0, %v163_v3  ;;  %v228_v24 = vadd.f32 3.0, %v164_v4 }
  0x57   : > { %541 = vst [vmem:[%s980_s17 + $0x98] sm:$0xff] %v477_v17  ;;  %542 = vst [vmem:[%s980_s17 + $0xa0] sm:$0xff] %v478_v18  ;;  %v481_v26 = vmul.f32 0.16666667, %v417_v20  ;;  %v229_v27 = vadd.f32 3.0, %v165_v5  ;;  %v230_v28 = vadd.f32 3.0, %v166_v10 }
  0x58   : > { %543 = vst [vmem:[%s980_s17 + $0xa8] sm:$0xff] %v479_v19  ;;  %v231_v29 = vadd.f32 3.0, %v167_v11  ;;  %544 = vst [vmem:[%s980_s17 + $0xb0] sm:$0xff] %v480_v21  ;;  %v290_v30 = vmax.f32 %v226_v22, 0.0  ;;  %v291_v31 = vmax.f32 %v227_v23, 0.0  ;;  %v292_v32 = vmax.f32 %v228_v24, 0.0 }
  0x59   : > { %v232_v33 = vadd.f32 3.0, %v168_v12  ;;  %545 = vst [vmem:[%s980_s17 + $0xb8] sm:$0xff] %v481_v26  ;;  %v293_v34 = vmax.f32 %v229_v27, 0.0  ;;  %v294_v35 = vmax.f32 %v230_v28, 0.0  ;;  %v233_v37 = vadd.f32 3.0, %v169_v25 }
  0x5a   : > { %v295_v36 = vmax.f32 %v231_v29, 0.0  ;;  %v354_v38 = vmin.f32 %v290_v30, 6.0  ;;  %v355_v39 = vmin.f32 %v291_v31, 6.0  ;;  %v356_v40 = vmin.f32 %v292_v32, 6.0  ;;  %v178_v30 = vld [vmem:[%s957_s30 + $0x140] sm:$0xff] }
  0x5b   : > { %v296_v41 = vmax.f32 %v232_v33, 0.0  ;;  %v357_v42 = vmin.f32 %v293_v34, 6.0  ;;  %v358_v43 = vmin.f32 %v294_v35, 6.0  ;;  %v297_v45 = vmax.f32 %v233_v37, 0.0  ;;  %v179_v35 = vld [vmem:[%s957_s30 + $0x148] sm:$0xff]  ;;  %v181_v37 = vld [vmem:[%s957_s30 + $0x158] sm:$0xff] }
  0x5c   : > { %v359_v44 = vmin.f32 %v295_v36, 6.0  ;;  %v418_v47 = vmul.f32 %v354_v38, %v162_v62  ;;  %v419_v48 = vmul.f32 %v355_v39, %v163_v3  ;;  %v420_v49 = vmul.f32 %v356_v40, %v164_v4  ;;  %v180_v36 = vld [vmem:[%s957_s30 + $0x150] sm:$0xff] }
  0x5d   : > { %v360_v50 = vmin.f32 %v296_v41, 6.0  ;;  %v421_v54 = vmul.f32 %v357_v42, %v165_v5  ;;  %v422_v55 = vmul.f32 %v358_v43, %v166_v10  ;;  %v361_v57 = vmin.f32 %v297_v45, 6.0  ;;  %v182_v42 = vld [vmem:[%s957_s30 + $0x160] sm:$0xff]  ;;  %v183_v43 = vld [vmem:[%s957_s30 + $0x168] sm:$0xff] }
  0x5e   : > { %v423_v56 = vmul.f32 %v359_v44, %v167_v11  ;;  %v482_v61 = vmul.f32 0.16666667, %v418_v47  ;;  %v483_v62 = vmul.f32 0.16666667, %v419_v48  ;;  %v484_v63 = vmul.f32 0.16666667, %v420_v49 }
  0x5f   : > { %v424_v0 = vmul.f32 %v360_v50, %v168_v12  ;;  %v485_v1 = vmul.f32 0.16666667, %v421_v54  ;;  %v486_v2 = vmul.f32 0.16666667, %v422_v55  ;;  %v425_v4 = vmul.f32 %v361_v57, %v169_v25  ;;  %v184_v44 = vld [vmem:[%s957_s30 + $0x170] sm:$0xff]  ;;  %v185_v57 = vld [vmem:[%s957_s30 + $0x178] sm:$0xff] }
  0x60   : > { %v487_v3 = vmul.f32 0.16666667, %v423_v56  ;;  %546 = vst [vmem:[%s980_s17 + $0xc0] sm:$0xff] %v482_v61  ;;  %547 = vst [vmem:[%s980_s17 + $0xc8] sm:$0xff] %v483_v62  ;;  %v234_v6 = vadd.f32 3.0, %v170_v46  ;;  %v235_v7 = vadd.f32 3.0, %v171_v51 }
  0x61   : > { %548 = vst [vmem:[%s980_s17 + $0xd0] sm:$0xff] %v484_v63  ;;  %v488_v5 = vmul.f32 0.16666667, %v424_v0  ;;  %v236_v8 = vadd.f32 3.0, %v172_v52  ;;  %549 = vst [vmem:[%s980_s17 + $0xd8] sm:$0xff] %v485_v1  ;;  %v237_v11 = vadd.f32 3.0, %v173_v53 }
  0x62   : > { %550 = vst [vmem:[%s980_s17 + $0xe0] sm:$0xff] %v486_v2  ;;  %551 = vst [vmem:[%s980_s17 + $0xe8] sm:$0xff] %v487_v3  ;;  %v489_v10 = vmul.f32 0.16666667, %v425_v4  ;;  %v238_v12 = vadd.f32 3.0, %v174_v58  ;;  %v239_v13 = vadd.f32 3.0, %v175_v59 }
  0x63   : > { %552 = vst [vmem:[%s980_s17 + $0xf0] sm:$0xff] %v488_v5  ;;  %v298_v14 = vmax.f32 %v234_v6, 0.0  ;;  %v299_v15 = vmax.f32 %v235_v7, 0.0  ;;  %v300_v16 = vmax.f32 %v236_v8, 0.0  ;;  %v240_v17 = vadd.f32 3.0, %v176_v60 }
  0x64   : > { %553 = vst [vmem:[%s980_s17 + $0xf8] sm:$0xff] %v489_v10  ;;  %v301_v18 = vmax.f32 %v237_v11, 0.0  ;;  %v302_v19 = vmax.f32 %v238_v12, 0.0  ;;  %v303_v20 = vmax.f32 %v239_v13, 0.0  ;;  %v241_v21 = vadd.f32 3.0, %v177_v9 }
  0x65   : > { %v362_v22 = vmin.f32 %v298_v14, 6.0  ;;  %v363_v23 = vmin.f32 %v299_v15, 6.0  ;;  %v364_v24 = vmin.f32 %v300_v16, 6.0  ;;  %v304_v25 = vmax.f32 %v240_v17, 0.0  ;;  %v186_v14 = vld [vmem:[%s957_s30 + $0x180] sm:$0xff] }
  0x66   : > { %v365_v26 = vmin.f32 %v301_v18, 6.0  ;;  %v366_v27 = vmin.f32 %v302_v19, 6.0  ;;  %v367_v28 = vmin.f32 %v303_v20, 6.0  ;;  %v305_v29 = vmax.f32 %v241_v21, 0.0  ;;  %v187_v19 = vld [vmem:[%s957_s30 + $0x188] sm:$0xff]  ;;  %v188_v20 = vld [vmem:[%s957_s30 + $0x190] sm:$0xff] }
  0x67   : > { %v426_v31 = vmul.f32 %v362_v22, %v170_v46  ;;  %v427_v32 = vmul.f32 %v363_v23, %v171_v51  ;;  %v428_v33 = vmul.f32 %v364_v24, %v172_v52  ;;  %v368_v34 = vmin.f32 %v304_v25, 6.0  ;;  %v189_v21 = vld [vmem:[%s957_s30 + $0x198] sm:$0xff] }
  0x68   : > { %v429_v38 = vmul.f32 %v365_v26, %v173_v53  ;;  %v430_v39 = vmul.f32 %v366_v27, %v174_v58  ;;  %v431_v40 = vmul.f32 %v367_v28, %v175_v59  ;;  %v369_v41 = vmin.f32 %v305_v29, 6.0  ;;  %v190_v26 = vld [vmem:[%s957_s30 + $0x1a0] sm:$0xff]  ;;  %v191_v27 = vld [vmem:[%s957_s30 + $0x1a8] sm:$0xff]  ;;  %v192_v28 = vld [vmem:[%s957_s30 + $0x1b0] sm:$0xff] }
  0x69   : > { %v490_v45 = vmul.f32 0.16666667, %v426_v31  ;;  %v491_v46 = vmul.f32 0.16666667, %v427_v32  ;;  %v492_v47 = vmul.f32 0.16666667, %v428_v33  ;;  %v432_v48 = vmul.f32 %v368_v34, %v176_v60 }
  0x6a   : > { %v493_v49 = vmul.f32 0.16666667, %v429_v38  ;;  %v494_v50 = vmul.f32 0.16666667, %v430_v39  ;;  %v495_v51 = vmul.f32 0.16666667, %v431_v40  ;;  %v433_v52 = vmul.f32 %v369_v41, %v177_v9 }
  0x6b   : > { %554 = vst [vmem:[%s980_s17 + $0x100] sm:$0xff] %v490_v45  ;;  %555 = vst [vmem:[%s980_s17 + $0x108] sm:$0xff] %v491_v46  ;;  %v496_v53 = vmul.f32 0.16666667, %v432_v48  ;;  %v242_v54 = vadd.f32 3.0, %v178_v30  ;;  %v243_v55 = vadd.f32 3.0, %v179_v35 }
  0x6c   : > { %556 = vst [vmem:[%s980_s17 + $0x110] sm:$0xff] %v492_v47  ;;  %v244_v56 = vadd.f32 3.0, %v180_v36  ;;  %557 = vst [vmem:[%s980_s17 + $0x118] sm:$0xff] %v493_v49  ;;  %v497_v58 = vmul.f32 0.16666667, %v433_v52  ;;  %v245_v59 = vadd.f32 3.0, %v181_v37 }
  0x6d   : > { %558 = vst [vmem:[%s980_s17 + $0x120] sm:$0xff] %v494_v50  ;;  %559 = vst [vmem:[%s980_s17 + $0x128] sm:$0xff] %v495_v51  ;;  %v246_v60 = vadd.f32 3.0, %v182_v42  ;;  %v247_v61 = vadd.f32 3.0, %v183_v43  ;;  %v306_v62 = vmax.f32 %v242_v54, 0.0  ;;  %v307_v63 = vmax.f32 %v243_v55, 0.0 }
  0x6e   : > { %560 = vst [vmem:[%s980_s17 + $0x130] sm:$0xff] %v496_v53  ;;  %v308_v0 = vmax.f32 %v244_v56, 0.0  ;;  %v248_v1 = vadd.f32 3.0, %v184_v44  ;;  %561 = vst [vmem:[%s980_s17 + $0x138] sm:$0xff] %v497_v58  ;;  %v309_v2 = vmax.f32 %v245_v59, 0.0  ;;  %v249_v5 = vadd.f32 3.0, %v185_v57 }
  0x6f   : > { %v310_v3 = vmax.f32 %v246_v60, 0.0  ;;  %v311_v4 = vmax.f32 %v247_v61, 0.0  ;;  %v370_v6 = vmin.f32 %v306_v62, 6.0  ;;  %v371_v7 = vmin.f32 %v307_v63, 6.0  ;;  %v193_v41 = vld [vmem:[%s957_s30 + $0x1b8] sm:$0xff]  ;;  %v194_v62 = vld [vmem:[%s957_s30 + $0x1c0] sm:$0xff] }
  0x70   : > { %v372_v8 = vmin.f32 %v308_v0, 6.0  ;;  %v312_v9 = vmax.f32 %v248_v1, 0.0  ;;  %v373_v10 = vmin.f32 %v309_v2, 6.0  ;;  %v313_v13 = vmax.f32 %v249_v5, 0.0  ;;  %v197_v5 = vld [vmem:[%s957_s30 + $0x1d8] sm:$0xff] }
  0x71   : > { %v374_v11 = vmin.f32 %v310_v3, 6.0  ;;  %v375_v12 = vmin.f32 %v311_v4, 6.0  ;;  %v434_v15 = vmul.f32 %v370_v6, %v178_v30  ;;  %v435_v16 = vmul.f32 %v371_v7, %v179_v35  ;;  %v195_v3 = vld [vmem:[%s957_s30 + $0x1c8] sm:$0xff]  ;;  %v196_v4 = vld [vmem:[%s957_s30 + $0x1d0] sm:$0xff] }
  0x72   : > { %v436_v17 = vmul.f32 %v372_v8, %v180_v36  ;;  %v376_v18 = vmin.f32 %v312_v9, 6.0  ;;  %v437_v22 = vmul.f32 %v373_v10, %v181_v37  ;;  %v377_v25 = vmin.f32 %v313_v13, 6.0  ;;  %v198_v10 = vld [vmem:[%s957_s30 + $0x1e0] sm:$0xff] }
  0x73   : > { %v438_v23 = vmul.f32 %v374_v11, %v182_v42  ;;  %v439_v24 = vmul.f32 %v375_v12, %v183_v43  ;;  %v498_v29 = vmul.f32 0.16666667, %v434_v15  ;;  %v499_v30 = vmul.f32 0.16666667, %v435_v16  ;;  %v199_v11 = vld [vmem:[%s957_s30 + $0x1e8] sm:$0xff]  ;;  %v200_v12 = vld [vmem:[%s957_s30 + $0x1f0] sm:$0xff] }
  0x74   : > { %v500_v31 = vmul.f32 0.16666667, %v436_v17  ;;  %v440_v32 = vmul.f32 %v376_v18, %v184_v44  ;;  %v501_v33 = vmul.f32 0.16666667, %v437_v22  ;;  %v441_v36 = vmul.f32 %v377_v25, %v185_v57  ;;  %v201_v25 = vld [vmem:[%s957_s30 + $0x1f8] sm:$0xff] }
  0x75   : > { %v502_v34 = vmul.f32 0.16666667, %v438_v23  ;;  %v503_v35 = vmul.f32 0.16666667, %v439_v24  ;;  %562 = vst [vmem:[%s980_s17 + $0x140] sm:$0xff] %v498_v29  ;;  %563 = vst [vmem:[%s980_s17 + $0x148] sm:$0xff] %v499_v30 }
  0x76   : > { %564 = vst [vmem:[%s980_s17 + $0x150] sm:$0xff] %v500_v31  ;;  %v504_v37 = vmul.f32 0.16666667, %v440_v32  ;;  %v250_v38 = vadd.f32 3.0, %v186_v14  ;;  %v251_v39 = vadd.f32 3.0, %v187_v19  ;;  %v252_v40 = vadd.f32 3.0, %v188_v20 }
  0x77   : > { %565 = vst [vmem:[%s980_s17 + $0x158] sm:$0xff] %v501_v33  ;;  %566 = vst [vmem:[%s980_s17 + $0x160] sm:$0xff] %v502_v34  ;;  %v505_v42 = vmul.f32 0.16666667, %v441_v36  ;;  %v253_v43 = vadd.f32 3.0, %v189_v21  ;;  %v254_v44 = vadd.f32 3.0, %v190_v26 }
  0x78   : > { %567 = vst [vmem:[%s980_s17 + $0x168] sm:$0xff] %v503_v35  ;;  %v255_v45 = vadd.f32 3.0, %v191_v27  ;;  %568 = vst [vmem:[%s980_s17 + $0x170] sm:$0xff] %v504_v37  ;;  %v314_v46 = vmax.f32 %v250_v38, 0.0  ;;  %v315_v47 = vmax.f32 %v251_v39, 0.0  ;;  %v316_v48 = vmax.f32 %v252_v40, 0.0 }
  0x79   : > { %v256_v49 = vadd.f32 3.0, %v192_v28  ;;  %569 = vst [vmem:[%s980_s17 + $0x178] sm:$0xff] %v505_v42  ;;  %v317_v50 = vmax.f32 %v253_v43, 0.0  ;;  %v318_v51 = vmax.f32 %v254_v44, 0.0  ;;  %v257_v53 = vadd.f32 3.0, %v193_v41 }
  0x7a   : > { %v319_v52 = vmax.f32 %v255_v45, 0.0  ;;  %v378_v54 = vmin.f32 %v314_v46, 6.0  ;;  %v379_v55 = vmin.f32 %v315_v47, 6.0  ;;  %v380_v56 = vmin.f32 %v316_v48, 6.0 }
  0x7b   : > { %v320_v57 = vmax.f32 %v256_v49, 0.0  ;;  %v381_v58 = vmin.f32 %v317_v50, 6.0  ;;  %v382_v59 = vmin.f32 %v318_v51, 6.0  ;;  %v321_v61 = vmax.f32 %v257_v53, 0.0 }
  0x7c   : > { %v383_v60 = vmin.f32 %v319_v52, 6.0  ;;  %v442_v63 = vmul.f32 %v378_v54, %v186_v14  ;;  %v443_v0 = vmul.f32 %v379_v55, %v187_v19  ;;  %v444_v1 = vmul.f32 %v380_v56, %v188_v20 }
  0x7d   : > { %v384_v2 = vmin.f32 %v320_v57, 6.0  ;;  %v445_v6 = vmul.f32 %v381_v58, %v189_v21  ;;  %v446_v7 = vmul.f32 %v382_v59, %v190_v26  ;;  %v385_v9 = vmin.f32 %v321_v61, 6.0 }
  0x7e   : > { %v447_v8 = vmul.f32 %v383_v60, %v191_v27  ;;  %v506_v13 = vmul.f32 0.16666667, %v442_v63  ;;  %v507_v14 = vmul.f32 0.16666667, %v443_v0  ;;  %v508_v15 = vmul.f32 0.16666667, %v444_v1 }
  0x7f   : > { %v448_v16 = vmul.f32 %v384_v2, %v192_v28  ;;  %v509_v17 = vmul.f32 0.16666667, %v445_v6  ;;  %v510_v18 = vmul.f32 0.16666667, %v446_v7  ;;  %v449_v20 = vmul.f32 %v385_v9, %v193_v41 }
  0x80   : > { %v511_v19 = vmul.f32 0.16666667, %v447_v8  ;;  %570 = vst [vmem:[%s980_s17 + $0x180] sm:$0xff] %v506_v13  ;;  %571 = vst [vmem:[%s980_s17 + $0x188] sm:$0xff] %v507_v14  ;;  %v258_v22 = vadd.f32 3.0, %v194_v62  ;;  %v259_v23 = vadd.f32 3.0, %v195_v3 }
  0x81   : > { %572 = vst [vmem:[%s980_s17 + $0x190] sm:$0xff] %v508_v15  ;;  %v512_v21 = vmul.f32 0.16666667, %v448_v16  ;;  %v260_v24 = vadd.f32 3.0, %v196_v4  ;;  %573 = vst [vmem:[%s980_s17 + $0x198] sm:$0xff] %v509_v17  ;;  %v261_v27 = vadd.f32 3.0, %v197_v5 }
  0x82   : > { %574 = vst [vmem:[%s980_s17 + $0x1a0] sm:$0xff] %v510_v18  ;;  %575 = vst [vmem:[%s980_s17 + $0x1a8] sm:$0xff] %v511_v19  ;;  %v513_v26 = vmul.f32 0.16666667, %v449_v20  ;;  %v262_v28 = vadd.f32 3.0, %v198_v10  ;;  %v263_v29 = vadd.f32 3.0, %v199_v11 }
  0x83   : > { %576 = vst [vmem:[%s980_s17 + $0x1b0] sm:$0xff] %v512_v21  ;;  %v322_v30 = vmax.f32 %v258_v22, 0.0  ;;  %v323_v31 = vmax.f32 %v259_v23, 0.0  ;;  %v324_v32 = vmax.f32 %v260_v24, 0.0  ;;  %v264_v33 = vadd.f32 3.0, %v200_v12 }
  0x84   : > { %577 = vst [vmem:[%s980_s17 + $0x1b8] sm:$0xff] %v513_v26  ;;  %v325_v34 = vmax.f32 %v261_v27, 0.0  ;;  %v326_v35 = vmax.f32 %v262_v28, 0.0  ;;  %v327_v36 = vmax.f32 %v263_v29, 0.0  ;;  %v265_v37 = vadd.f32 3.0, %v201_v25 }
  0x85   : > { %v386_v38 = vmin.f32 %v322_v30, 6.0  ;;  %v387_v39 = vmin.f32 %v323_v31, 6.0  ;;  %v388_v40 = vmin.f32 %v324_v32, 6.0  ;;  %v328_v41 = vmax.f32 %v264_v33, 0.0 }
  0x86   : > { %v389_v42 = vmin.f32 %v325_v34, 6.0  ;;  %v390_v43 = vmin.f32 %v326_v35, 6.0  ;;  %v391_v44 = vmin.f32 %v327_v36, 6.0  ;;  %v329_v45 = vmax.f32 %v265_v37, 0.0 }
  0x87   : > { %v450_v46 = vmul.f32 %v386_v38, %v194_v62  ;;  %v451_v47 = vmul.f32 %v387_v39, %v195_v3  ;;  %v452_v48 = vmul.f32 %v388_v40, %v196_v4  ;;  %v392_v49 = vmin.f32 %v328_v41, 6.0 }
  0x88   : > { %v453_v50 = vmul.f32 %v389_v42, %v197_v5  ;;  %v454_v51 = vmul.f32 %v390_v43, %v198_v10  ;;  %v455_v52 = vmul.f32 %v391_v44, %v199_v11  ;;  %v393_v53 = vmin.f32 %v329_v45, 6.0 }
  0x89   : > { %v514_v54 = vmul.f32 0.16666667, %v450_v46  ;;  %v515_v55 = vmul.f32 0.16666667, %v451_v47  ;;  %v516_v56 = vmul.f32 0.16666667, %v452_v48  ;;  %v456_v57 = vmul.f32 %v392_v49, %v200_v12 }
  0x8a   : > { %v517_v58 = vmul.f32 0.16666667, %v453_v50  ;;  %v518_v59 = vmul.f32 0.16666667, %v454_v51  ;;  %v519_v60 = vmul.f32 0.16666667, %v455_v52  ;;  %v457_v61 = vmul.f32 %v393_v53, %v201_v25 }
  0x8b   : > { %578 = vst [vmem:[%s980_s17 + $0x1c0] sm:$0xff] %v514_v54  ;;  %579 = vst [vmem:[%s980_s17 + $0x1c8] sm:$0xff] %v515_v55  ;;  %v520_v62 = vmul.f32 0.16666667, %v456_v57 }
  0x8c   : > { %580 = vst [vmem:[%s980_s17 + $0x1d0] sm:$0xff] %v516_v56  ;;  %581 = vst [vmem:[%s980_s17 + $0x1d8] sm:$0xff] %v517_v58  ;;  %v521_v63 = vmul.f32 0.16666667, %v457_v61 }
  0x8d   : > { %582 = vst [vmem:[%s980_s17 + $0x1e0] sm:$0xff] %v518_v59  ;;  %583 = vst [vmem:[%s980_s17 + $0x1e8] sm:$0xff] %v519_v60 }
  0x8e   : > { %584 = vst [vmem:[%s980_s17 + $0x1f0] sm:$0xff] %v520_v62  ;;  %585 = vst [vmem:[%s980_s17 + $0x1f8] sm:$0xff] %v521_v63 }
  0x8f   : > { %785 = shalt.err (!%p782_p10)
}
  0x90   : > { %s786_s13 = scalar_lea.hbm %s1095_s29, 8192  ;;  %s790_s20 = scalar_lea.hbm %s1146_s1, 16384 }
  0x91   : > { %p787_p0 = scmp.ne.s32.totalorder %s1095_s29, %s786_s13  ;;  %p791_p1 = scmp.lt.s32.totalorder %s1095_s29, %s1146_s1 }
  0x92   : > { %p792_p3 = scmp.lt.s32.totalorder %s790_s20, %s786_s13 }
  0x93   : > { %p788_p2 = pnand %p787_p0, %p1155_p12 }
  0x94   : > { %p793_p6 = por %p792_p3, %p791_p1 }
  0x95   : > { %p789_p9 = pneg %p788_p2 }
  0x97   : > { %p794_p11 = pnand %p793_p6, %p789_p9 }
  0x99   : > { %797 = shalt.err (!%p794_p11)
}
  0x9a   : > { %s842_s24 = smov 2048   ;;  %s843_s26 = smov 128  }
  0x9b   : > { %696 = dma.vmem_to_hbm [thread:$0]  (%p1155_p12), %s1097_s27, 8192, %s1095_s29, %s587_s2, %s842_s24, %s842_s24, %s843_s26  }
  0x9c PF: > { %s616_s30 = sand.u32 1, %s824_s6   ;;  %p1156_p13 = scmp.ne.s32.totalorder %s1152_s19, 0 }
  0x9d   : > { %p1157_p4 = scmp.ge.s32.totalorder %s836_s9, 2  ;;  %s617_s17 = scalar_lea.sflag [#allocation4], %s616_s30 }
  0x9f   : > { %p703_p5 = pnand %p1157_p4, %p1156_p13 }
  0xa1   : > { %p704_p7 = pneg %p703_p5 }
  0xa3   : > { %819 = dma.done.wait (%p704_p7), %s617_s17, 8192  }
  0xa4   : > { %821 = vsyncadd (%p704_p7), %s617_s17, 4294959104  ;;  %p14_p8 = scmp.ge.s32.totalorder %s879_s12, 4   ;;  %s1158_s6 = smov %s828_s7 }
  0xa5   : > { %s1159_s7 = smov %s832_s8  ;;  %s1160_s8 = smov %s891_s15 }
  0xa6   : > { %s1161_s9 = smov %s879_s12  ;;  %16 = sbr.rel (!%p14_p8) target bundleno = 5 (0x5), region = 69 }
  0xab   :  { %622 = vsyncpa [#allocation3], 1 }
  0xac   :  { %624 = vsyncpa [#allocation3 + $0x1], 1 }
  0xad   :  { %625 = vsyncpa [#allocation4], 1 }
  0xae   :  { %627 = vsyncpa [#allocation4 + $0x1], 1 }

</bundles_post_ra>
